<compile_context>
chip_gen: v7x
topology: tpu7x:2x2x1
jax: 0.10.0
libtpu: 0.0.40
codegen_flags: <defaults>
</compile_context>

<pallas_src>
import jax
import jax.numpy as jnp
from jax.experimental import pallas as pl
from jax.experimental.pallas import tpu as pltpu

_MIB = 1024 * 1024


def _cdiv(a: int, b: int) -> int:
    return (a + b - 1) // b


def _round_up(x: int, m: int) -> int:
    return _cdiv(x, m) * m


# ----------------------------------------------------------------------------
# Kernels
# ----------------------------------------------------------------------------
def _mm_kernel_accum_out(x_ref, w_ref, o_ref):
    """f32 output: accumulate directly into the resident output block."""

    @pl.when(pl.program_id(2) == 0)
    def _init():
        o_ref[...] = jnp.zeros_like(o_ref)

    o_ref[...] += jnp.dot(
        x_ref[...], w_ref[...], preferred_element_type=jnp.float32
    )


def _mm_kernel_scratch(x_ref, w_ref, o_ref, acc_ref):
    """Low-precision output: f32 VMEM accumulator, cast on the last K step."""

    @pl.when(pl.program_id(2) == 0)
    def _init():
        acc_ref[...] = jnp.zeros_like(acc_ref)

    acc_ref[...] += jnp.dot(
        x_ref[...], w_ref[...], preferred_element_type=jnp.float32
    )

    @pl.when(pl.program_id(2) == pl.num_programs(2) - 1)
    def _finalize():
        o_ref[...] = acc_ref[...].astype(o_ref.dtype)


# ----------------------------------------------------------------------------
# Tile selection / weight preparation
# ----------------------------------------------------------------------------
def _select_tiles(M: int, K: int, D: int, compute_dtype):
    """Pick (tm, tn, tk, weight_buffer_count) for the (M,K)@(K,D) GEMM."""
    bf16 = jnp.dtype(compute_dtype).itemsize < 4
    decode = M <= 256

    if decode:
        # Decode: pure weight streaming — collapse M, use big weight slabs and
        # deeper weight buffering.
        tm_t, tn_t = 256, 2048
        tk_t = 2048 if bf16 else 1024
        wbuf = 3
    else:
        # Prefill: 256-multiple tiles that keep arithmetic intensity high while
        # fitting comfortably in v7x's 64 MiB VMEM.
        tm_t, tn_t = 512, 1024
        tk_t = 1024 if bf16 else 512
        wbuf = 2

    # Full-dim blocks are always layout-legal; otherwise keep 128/256-multiples.
    tm = M if M <= tm_t else tm_t
    tn = D if D <= tn_t else tn_t

    if K <= tk_t:
        tk = K
    else:
        tk = tk_t
        for cand in range(tk_t, 0, -128):   # prefer a dividing tile: no K pad
            if K % cand == 0:
                tk = cand
                break

    # v7x has 2 TensorCores sharded over the "parallel" axes: make sure the
    # parallel grid has at least 2 steps when the M axis collapses.
    if _cdiv(M, tm) == 1 and _cdiv(D, tn) == 1 and D >= 256:
        tn = _round_up(_cdiv(D, 2), 128)

    return tm, tn, tk, wbuf


def _prepare_weight_2d(w3d: jax.Array, tk: int, tn: int, compute_dtype):
    """Reshape (N,H,D)->(K,D), cast to compute dtype, zero-pad to tile grid."""
    N, H, D = w3d.shape
    K = N * H
    Kp = _round_up(K, tk)
    Dp = _round_up(D, tn)
    w2d = w3d.reshape(K, D).astype(compute_dtype)
    if (Kp, Dp) != (K, D):
        w2d = jnp.pad(w2d, ((0, Kp - K), (0, Dp - D)))
    return w2d


# ----------------------------------------------------------------------------
# Pallas GEMM
# ----------------------------------------------------------------------------
def _pallas_matmul(x2d: jax.Array, w2d: jax.Array, *, M: int, D: int,
                   tm: int, tn: int, tk: int, wbuf: int, out_dtype):
    """(M, Kp) @ (Kp, Dp) -> (M, D); ragged M/D edges handled by masked stores."""
    Mx, Kp = x2d.shape
    Kp2, Dp = w2d.shape
    assert Kp == Kp2 and Mx == M
    assert Kp % tk == 0 and Dp % tn == 0

    grid = (_cdiv(M, tm), Dp // tn, Kp // tk)

    x_spec = pl.BlockSpec((tm, tk), lambda i, j, k: (i, k))
    w_map = lambda i, j, k: (k, j)
    w_spec = pl.BlockSpec((tk, tn), w_map)
    if wbuf > 2 and grid[2] >= wbuf and hasattr(pl, "Buffered"):
        try:  # deeper weight pipelining for decode-style weight streaming
            w_spec = pl.BlockSpec((tk, tn), w_map,
                                  pipeline_mode=pl.Buffered(wbuf))
        except TypeError:
            w_spec = pl.BlockSpec((tk, tn), w_map)
    out_spec = pl.BlockSpec((tm, tn), lambda i, j, k: (i, j))

    acc_into_out = jnp.dtype(out_dtype) == jnp.dtype(jnp.float32)
    kernel = _mm_kernel_accum_out if acc_into_out else _mm_kernel_scratch
    scratch = [] if acc_into_out else [pltpu.VMEM((tm, tn), jnp.float32)]

    x_isz = x2d.dtype.itemsize
    w_isz = w2d.dtype.itemsize
    o_isz = jnp.dtype(out_dtype).itemsize

    # Actual double-buffered footprint + headroom, capped so it is safe on the
    # 64 MiB v7x VMEM while exceeding the small default scoped limits.
    footprint = (2 * tm * tk * x_isz
                 + max(wbuf, 2) * tk * tn * w_isz
                 + 2 * tm * tn * o_isz
                 + (0 if acc_into_out else tm * tn * 4))
    vmem_limit = int(min(48 * _MIB, max(footprint + 8 * _MIB, 16 * _MIB)))

    flops = 2 * M * Kp * Dp
    bytes_accessed = (grid[1] * M * Kp * x_isz      # x re-streamed per D tile
                      + grid[0] * Kp * Dp * w_isz   # w re-streamed per M tile
                      + M * Dp * o_isz)

    return pl.pallas_call(
        kernel,
        out_shape=jax.ShapeDtypeStruct((M, D), out_dtype),
        grid_spec=pltpu.PrefetchScalarGridSpec(
            num_scalar_prefetch=0,
            grid=grid,
            in_specs=[x_spec, w_spec],
            out_specs=out_spec,
            scratch_shapes=scratch,
        ),
        compiler_params=pltpu.CompilerParams(
            dimension_semantics=("parallel", "parallel", "arbitrary"),
            vmem_limit_bytes=vmem_limit,
        ),
        cost_estimate=pl.CostEstimate(
            flops=int(flops), transcendentals=0,
            bytes_accessed=int(bytes_accessed),
        ),
    )(x2d, w2d)


# ----------------------------------------------------------------------------
# Public wrappers
# ----------------------------------------------------------------------------
def einsum_btnh_nhd(x: jax.Array, w: jax.Array, *,
                    compute_dtype=jnp.bfloat16) -> jax.Array:
    """einsum('BTNH,NHD->BTD', x, w) via the tiled Pallas GEMM.

    Convenience functional form: the weight is prepared per call. Prefer
    EinsumPallas, which caches the reshaped / cast / padded weight.
    """
    B, T, N, H = x.shape
    Nw, Hw, D = w.shape
    assert (N, H) == (Nw, Hw), "activation and weight contraction dims differ"

    compute_dtype = jnp.dtype(jnp.float32 if compute_dtype is None
                              else compute_dtype)
    out_dtype = x.dtype
    M, K = B * T, N * H

    tm, tn, tk, wbuf = _select_tiles(M, K, D, compute_dtype)
    w2d = _prepare_weight_2d(w, tk, tn, compute_dtype)
    Kp = w2d.shape[0]

    x2d = x.reshape(M, K).astype(compute_dtype)
    if Kp != K:  # rare: only when no dividing K tile exists
        x2d = jnp.pad(x2d, ((0, 0), (0, Kp - K)))

    out2d = _pallas_matmul(x2d, w2d, M=M, D=D, tm=tm, tn=tn, tk=tk,
                           wbuf=wbuf, out_dtype=out_dtype)
    return out2d.reshape(B, T, D)


class EinsumPallas:
    """JAX/Pallas equivalent of ai_edge_torch's Einsum for 'BTNH,NHD->BTD'.

    The fixed weight parameter is stored in f32 (module semantics); the
    compute-dtype cast + reshape + tile padding are cached per tile geometry so
    no per-call HBM copy of the parameter is made. Default compute path is
    bfloat16 operands with f32 accumulation (MXU-native on v5e/v6e/v7x); pass
    compute_dtype=jnp.float32 for exact f32 semantics.
    """

    def __init__(self, shape, einsum_str="BTNH,NHD->BTD", *, key=None,
                 compute_dtype=jnp.bfloat16):
        assert einsum_str == "BTNH,NHD->BTD", (
            "This kernel implements the canonical attention-output einsum; "
            "other strings reduce to the same flatten+matmul pattern."
        )
        # TODO(synk): generic einsum-string parsing (arbitrary contraction
        # patterns) is not implemented; only the canonical projection is.
        self.shape = tuple(shape)           # (N, H, D)
        self.einsum_str = einsum_str
        self.compute_dtype = jnp.dtype(
            jnp.float32 if compute_dtype is None else compute_dtype)
        if key is None:
            key = jax.random.PRNGKey(0)
        # Deterministic synthetic init (stands in for init_fn).
        self.w = jax.random.normal(key, self.shape, dtype=jnp.float32) * 0.02
        self._w_cache = {}                  # (tk, tn) -> prepared 2-D weight

    def _weight_2d(self, tk: int, tn: int) -> jax.Array:
        cache_key = (tk, tn)
        if cache_key not in self._w_cache:
            self._w_cache[cache_key] = _prepare_weight_2d(
                self.w, tk, tn, self.compute_dtype)
        return self._w_cache[cache_key]

    def __call__(self, x: jax.Array) -> jax.Array:
        B, T, N, H = x.shape
        Nw, Hw, D = self.shape
        assert (N, H) == (Nw, Hw), "activation/weight contraction dims differ"

        out_dtype = x.dtype
        M, K = B * T, N * H
        tm, tn, tk, wbuf = _select_tiles(M, K, D, self.compute_dtype)

        w2d = self._weight_2d(tk, tn)       # cached: no per-call weight copy
        Kp = w2d.shape[0]

        x2d = x.reshape(M, K).astype(self.compute_dtype)
        if Kp != K:
            x2d = jnp.pad(x2d, ((0, 0), (0, Kp - K)))

        out2d = _pallas_matmul(x2d, w2d, M=M, D=D, tm=tm, tn=tn, tk=tk,
                               wbuf=wbuf, out_dtype=out_dtype)
        return out2d.reshape(B, T, D)


# ----------------------------------------------------------------------------
# Self-test
# ----------------------------------------------------------------------------
if __name__ == "__main__":
    key = jax.random.PRNGKey(0)
    kx1, kw1, kx2, kw2, kx3, kw3, kx4, kw4 = jax.random.split(key, 8)

    def ref_einsum(x, w, compute_dtype):
        xc = x.astype(compute_dtype).astype(jnp.float32)
        wc = w.astype(compute_dtype).astype(jnp.float32)
        return jnp.einsum("BTNH,NHD->BTD", xc, wc)

    # 1) Canonical small shapes, default bf16 compute path, f32 in/out.
    B, T, N, H, D = 2, 8, 4, 8, 32
    x = jax.random.normal(kx1, (B, T, N, H), dtype=jnp.float32)
    layer = EinsumPallas((N, H, D), key=kw1)
    out = jax.block_until_ready(layer(x))
    ref = ref_einsum(x, layer.w, layer.compute_dtype)
    assert out.shape == (B, T, D) and out.dtype == x.dtype
    assert jnp.allclose(out, ref, atol=1e-3, rtol=1e-3)

    # 2) Non-aligned tiny shapes (M=5, D=48), exact f32 compute path.
    B2, T2, D2 = 1, 5, 48
    x2 = jax.random.normal(kx2, (B2, T2, N, H), dtype=jnp.float32)
    layer2 = EinsumPallas((N, H, D2), key=kw2, compute_dtype=jnp.float32)
    out2 = jax.block_until_ready(layer2(x2))
    ref2 = jnp.einsum("BTNH,NHD->BTD", x2, layer2.w)
    assert out2.shape == (B2, T2, D2)
    assert jnp.allclose(out2, ref2, atol=1e-5, rtol=1e-5)

    # 3) Decode-style shape with multiple K steps and a split D grid; bf16
    #    activations exercise the scratch-accumulator kernel variant.
    B3, T3, N3, H3, D3 = 2, 64, 32, 128, 512
    x3 = jax.random.normal(
        kx3, (B3, T3, N3, H3), dtype=jnp.float32).astype(jnp.bfloat16)
    layer3 = EinsumPallas((N3, H3, D3), key=kw3)
    out3 = jax.block_until_ready(layer3(x3))
    ref3 = ref_einsum(x3, layer3.w, jnp.bfloat16)
    assert out3.shape == (B3, T3, D3) and out3.dtype == jnp.bfloat16
    assert jnp.allclose(out3.astype(jnp.float32), ref3, atol=3e-2, rtol=3e-2)

    # 4) Prefill-style shape with a ragged (partial) edge block along M.
    B4, T4, N4, H4, D4 = 3, 200, 8, 16, 384
    x4 = jax.random.normal(kx4, (B4, T4, N4, H4), dtype=jnp.float32)
    layer4 = EinsumPallas((N4, H4, D4), key=kw4)
    out4 = jax.block_until_ready(layer4(x4))
    ref4 = ref_einsum(x4, layer4.w, layer4.compute_dtype)
    assert out4.shape == (B4, T4, D4)
    assert jnp.allclose(out4, ref4, atol=1e-3, rtol=1e-3)

    print("KERNEL_OK")
</pallas_src>

<mosaic_0001>
module attributes {stable_mosaic.version = 11 : i64} {
  func.func @_mm_kernel_accum_out(%arg0: i32, %arg1: i32, %arg2: i32, %arg3: memref<16x32xbf16, #tpu.memory_space<vmem>>, %arg4: memref<32x32xbf16, #tpu.memory_space<vmem>>, %arg5: memref<16x32xf32, #tpu.memory_space<vmem>>) attributes {dimension_semantics = [#tpu.dimension_semantics<parallel>, #tpu.dimension_semantics<parallel>, #tpu.dimension_semantics<arbitrary>], iteration_bounds = array<i64: 1, 1, 1>, scalar_prefetch = 0 : i64, scratch_operands = 0 : i64, tpu.core_type = #tpu.core_type<tc>, window_params = [{transform_indices = @transform_0, window_bounds = array<i64: 16, 32>}, {transform_indices = @transform_1, window_bounds = array<i64: 32, 32>}, {transform_indices = @transform_2, window_bounds = array<i64: 16, 32>}]} {
    %c0_i32 = arith.constant 0 : i32
    %0 = arith.cmpi eq, %arg2, %c0_i32 : i32
    %1 = arith.extui %0 : i1 to i32
    %c0_i32_0 = arith.constant 0 : i32
    %2 = arith.cmpi ne, %1, %c0_i32_0 : i32
    scf.if %2 {
      %cst_8 = arith.constant 0.000000e+00 : f32
      %9 = vector.broadcast %cst_8 : f32 to vector<16x32xf32>
      %c0_9 = arith.constant 0 : index
      %c0_10 = arith.constant 0 : index
      %10 = vector.load %arg5[%c0_9, %c0_10] : memref<16x32xf32, #tpu.memory_space<vmem>>, vector<16x32xf32>
      tpu.vector_store %arg5[%c0_9, %c0_10], %9 {strides = array<i32>} : memref<16x32xf32, #tpu.memory_space<vmem>>, vector<16x32xf32>,
    } else {
    }
    %c0 = arith.constant 0 : index
    %c0_1 = arith.constant 0 : index
    %3 = vector.load %arg5[%c0, %c0_1] : memref<16x32xf32, #tpu.memory_space<vmem>>, vector<16x32xf32>
    %c0_2 = arith.constant 0 : index
    %c0_3 = arith.constant 0 : index
    %4 = vector.load %arg3[%c0_2, %c0_3] : memref<16x32xbf16, #tpu.memory_space<vmem>>, vector<16x32xbf16>
    %c0_4 = arith.constant 0 : index
    %c0_5 = arith.constant 0 : index
    %5 = vector.load %arg4[%c0_4, %c0_5] : memref<32x32xbf16, #tpu.memory_space<vmem>>, vector<32x32xbf16>
    %cst = arith.constant dense<0.000000e+00> : vector<16x32xf32>
    %6 = tpu.matmul %4, %5, %cst {dimension_numbers = #tpu.dot_dimension_numbers<[1], [0], [0], [1], [0, 0, 1, 1], [], []>} : vector<16x32xbf16>, vector<32x32xbf16>, vector<16x32xf32> -> vector<16x32xf32>
    %7 = arith.addf %3, %6 : vector<16x32xf32>
    %c0_6 = arith.constant 0 : index
    %c0_7 = arith.constant 0 : index
    %8 = vector.load %arg5[%c0_6, %c0_7] : memref<16x32xf32, #tpu.memory_space<vmem>>, vector<16x32xf32>
    tpu.vector_store %arg5[%c0_6, %c0_7], %7 {strides = array<i32>} : memref<16x32xf32, #tpu.memory_space<vmem>>, vector<16x32xf32>,
    return
  }
  func.func @transform_0(%arg0: i32, %arg1: i32, %arg2: i32) -> (i32, i32) {
    %c0_i32 = arith.constant 0 : i32
    return %arg0, %arg2 : i32, i32
  }
  func.func @transform_1(%arg0: i32, %arg1: i32, %arg2: i32) -> (i32, i32) {
    %c0_i32 = arith.constant 0 : i32
    return %arg2, %arg1 : i32, i32
  }
  func.func @transform_2(%arg0: i32, %arg1: i32, %arg2: i32) -> (i32, i32) {
    %c0_i32 = arith.constant 0 : i32
    return %arg0, %arg1 : i32, i32
  }
}

</mosaic_0001>

<bundles_post_ra>
// kernel: tpu_custom_call.1
= control target key start
LH: loop header
LB: loop body
LE: loop exit
PB: predicated region body
PF: predicated region fallthrough
CT: control target
= control target key end

     0   :  { %7 = vsyncpa [#allocation3], 0  ;;  %s304_s0 = inlined_call_operand.hbm [shape: bf16[16,32], index: 0, kind: input, shape index: {}]   ;;  %s305_s1 = inlined_call_operand.hbm [shape: bf16[32,32], index: 1, kind: input, shape index: {}]   ;;  %s306_s2 = inlined_call_operand.hbm [shape: f32[16,32], index: 2, kind: output, shape index: {}]  }
   0x1   :  { %8 = vsyncpa [#allocation6], 0 }
   0x2   :  { %9 = vsyncpa [#allocation4], 0  ;;  %s239_s9 = smov [#allocation2]   ;;  %s167_s13 = scalar_lea.hbm %s304_s0, 128 }
   0x3   :  { %s15_s10 = sshll.u32 %s239_s9, 4  ;;  %p168_p0 = scmp.ne.s32.totalorder %s304_s0, %s167_s13  ;;  %s16_s10 = int_to_ptr.vmem [resolvable:$true] %s15_s10 }
   0x4   :  { %p171_p1 = scmp.lt.u32.totalorder %s167_s13, %s304_s0 }
   0x6   :  { %p173_p2 = pnand %p171_p1, %p168_p0 }
   0x8   :  { %176 = shalt.err (!%p173_p2)
}
   0x9   :  { %s177_s18 = scalar_lea.vmem %s16_s10, 128  ;;  %p182_p4 = scmp.lt.s32.totalorder %s16_s10, %s16_s10 }
   0xa   :  { %p178_p3 = scmp.ne.s32.totalorder %s16_s10, %s177_s18  ;;  %p183_p5 = scmp.lt.s32.totalorder %s177_s18, %s177_s18 }
   0xc   :  { %p184_p6 = por %p183_p5, %p182_p4 }
   0xe   :  { %p185_p7 = pnand %p184_p6, %p178_p3 }
  0x10   :  { %188 = shalt.err (!%p185_p7)
}
  0x11   :  { %s240_s19 = smov 64   ;;  %s241_s20 = smov 4  }
  0x12   :  { %21 = dma.hbm_to_vmem [thread:$0]  %s304_s0, 128, %s16_s10, [#allocation3], %s240_s19, %s240_s19, %s241_s20  }
  0x13   :  { %s242_s23 = smov [#allocation5]   ;;  %s189_s27 = scalar_lea.hbm %s305_s1, 256 }
  0x14   :  { %s27_s24 = sshll.u32 %s242_s23, 4  ;;  %p190_p8 = scmp.ne.s32.totalorder %s305_s1, %s189_s27  ;;  %s28_s24 = int_to_ptr.vmem [resolvable:$true] %s27_s24 }
  0x15   :  { %p193_p9 = scmp.lt.u32.totalorder %s189_s27, %s305_s1 }
  0x17   :  { %p195_p10 = pnand %p193_p9, %p190_p8 }
  0x19   :  { %198 = shalt.err (!%p195_p10)
}
  0x1a   :  { %s199_s4 = scalar_lea.vmem %s28_s24, 256  ;;  %p204_p12 = scmp.lt.s32.totalorder %s28_s24, %s28_s24 }
  0x1b   :  { %p200_p11 = scmp.ne.s32.totalorder %s28_s24, %s199_s4  ;;  %p205_p13 = scmp.lt.s32.totalorder %s199_s4, %s199_s4 }
  0x1d   :  { %p206_p0 = por %p205_p13, %p204_p12 }
  0x1f   :  { %p207_p1 = pnand %p206_p0, %p200_p11 }
  0x21   :  { %210 = shalt.err (!%p207_p1)
}
  0x22   :  { %33 = dma.hbm_to_vmem [thread:$0]  %s305_s1, 256, %s28_s24, [#allocation6], %s240_s19, %s240_s19, %s241_s20  }
  0x23   :  { %233 = dma.done.wait [#allocation3], 128  }
  0x24   :  { %234 = vsyncadd [#allocation3], 4294967168 }
  0x25   :  { %235 = dma.done.wait [#allocation6], 256  }
  0x26   :  { %236 = vsyncadd [#allocation6], 4294967040  ;;  %vm45_vm0 = vcmask 261120   ;;  %v243_v0 = vmov 0.0   ;;  %vm244_vm1 = vmmov 0   ;;  %v164_v1 = vld [vmem:[#allocation5] sm:$0xff]  }
  0x27   :  { %147 = vmatprep.subr.bf16.mxu0 %v243_v0  ;;  %151 = vmatprep.mubr.msk.bf16.mxu0 %vm244_vm1, %v243_v0  ;;  %46 = vst.msk [vmem:[#allocation7] sm:$0xff] %vm45_vm0, %v243_v0  ;;  %47 = vst.msk [vmem:[#allocation7 + $0x8] sm:$0xff] %vm45_vm0, %v243_v0  ;;  %v165_v2 = vld [vmem:[#allocation5 + $0x8] sm:$0xff]   ;;  %v166_v3 = vld [vmem:[#allocation2] sm:$0xff]   ;;  %s245_s1 = smov [#allocation7]  }
  0x28   :  { %148 = vmatpush3.bf16.msra.mxu0 %v164_v1  ;;  %s127_s6 = sshll.u32 %s245_s1, 4  ;;  %s128_s6 = int_to_ptr.vmem [resolvable:$true] %s127_s6 }
  0x29   :  { %149 = vmatprep.subr.bf16.mxu0 %v243_v0  ;;  %s211_s7 = scalar_lea.vmem %s128_s6, 256  ;;  %p216_p3 = scmp.lt.s32.totalorder %s128_s6, %s128_s6 }
  0x2a   :  { %p212_p2 = scmp.ne.s32.totalorder %s128_s6, %s211_s7  ;;  %p217_p4 = scmp.lt.s32.totalorder %s211_s7, %s211_s7 }
  0x2c   :  { %150 = vmatpush3.bf16.msra.mxu0 %v165_v2  ;;  %p218_p5 = por %p217_p4, %p216_p3 }
  0x2e   :  { %v48_v4 = vld [vmem:[#allocation7] sm:$0xff]  ;;  %v49_v6 = vld [vmem:[#allocation7 + $0x8] sm:$0xff]  ;;  %p219_p6 = pnand %p218_p5, %p212_p2 }
  0x2f   :  { %152 = vmatmul.mubr.msk.bf16.vlgmr.msra.gmra.mrb[0].mxu0 %vm45_vm0, %v166_v3 }
 0x102   :  { %v111_v5 = vpop.f32.mrb[0].mxu0 }
 0x103   :  { %v118_v7 = vadd.f32 %v111_v5, %v48_v4  ;;  %v153_v8 = vpop.f32.mrb[1].mxu0 }
 0x104   :  { %v114_v9 = vpop.f32.mrb[2].mxu0 }
 0x105   :  { %120 = vst.msk [vmem:[#allocation7] sm:$0xff] %vm45_vm0, %v118_v7  ;;  %v119_v10 = vadd.f32 %v114_v9, %v49_v6  ;;  %v154_v11 = vpop.f32.mrb[3].mxu0 }
 0x107   :  { %121 = vst.msk [vmem:[#allocation7 + $0x8] sm:$0xff] %vm45_vm0, %v119_v10 }
 0x108   :  { %222 = shalt.err (!%p219_p6)
}
 0x109   :  { %s223_s10 = scalar_lea.hbm %s306_s2, 256 }
 0x10a   :  { %p224_p7 = scmp.ne.s32.totalorder %s306_s2, %s223_s10  ;;  %p227_p8 = scmp.lt.u32.totalorder %s223_s10, %s306_s2 }
 0x10c   :  { %p229_p9 = pnand %p227_p8, %p224_p7 }
 0x10e   :  { %232 = shalt.err (!%p229_p9)
}
 0x10f   :  { %s246_s15 = smov 128   ;;  %s247_s16 = smov 8  }
 0x110   :  { %133 = dma.vmem_to_hbm [thread:$0]  %s128_s6, 256, %s306_s2, [#allocation4], %s246_s15, %s246_s15, %s247_s16  }
 0x111   :  { %237 = dma.done.wait [#allocation4], 256  }
 0x112   :  { %238 = vsyncadd [#allocation4], 4294967040 }
 0x113   :  { %137 = vsyncpa [#allocation3], 1 }
 0x114   :  { %138 = vsyncpa [#allocation6], 1 }
 0x115   :  { %139 = vsyncpa [#allocation4], 1 }

</bundles_post_ra>
